<compile_context>
chip_gen: v6e
topology: v6e:2x2x1
jax: 0.10.0
libtpu: 0.0.40
codegen_flags: <defaults>
</compile_context>

<pallas_src>
import functools
import math

import jax
import jax.numpy as jnp
from jax.experimental import pallas as pl
from jax.experimental.pallas import tpu as pltpu

LN_EPS = 1e-5  # PyTorch nn.LayerNorm default


def _round_up(x, m):
    return (x + m - 1) // m * m


def _layernorm(x, gamma, beta):
    mu = jnp.mean(x, axis=-1, keepdims=True)
    var = jnp.mean((x - mu) * (x - mu), axis=-1, keepdims=True)
    return (x - mu) * jax.lax.rsqrt(var + LN_EPS) * gamma + beta


def fused_forward_kernel(
    slab_ref,   # (TM, 128) bf16 : [4*intd embeds | elapsed | avg_corr | 0pad]
    w1_ref,     # (128, 128) bf16: cols[0:hd)=comb_proj, cols[hd:hd+intd)=cont rows 84/85
    b1_ref,     # (1, 128)  f32  : [b_comb | b_cont | 0]
    g1_ref,     # (1, 128)  f32  : cont LN gamma on lanes [hd:hd+intd)
    be1_ref,    # (1, 128)  f32  : cont LN beta  on lanes [hd:hd+intd)
    w2_ref,     # (128, hd) bf16 : rows[0:hd)=X part, rows[hd:hd+intd)=cont part, rest 0
    b2_ref,     # (1, hd)   f32
    g2_ref,     # (1, hd)   f32  : final LN gamma
    be2_ref,    # (1, hd)   f32  : final LN beta
    out_ref,    # (TM, hd)  bf16
    *, hd, intd,
):
    # Fused comb_proj + cont_proj Linear: one (TM,128)@(128,128) bf16 MXU pass.
    h = jnp.dot(slab_ref[...], w1_ref[...],
                preferred_element_type=jnp.float32) + b1_ref[...]

    # cont LayerNorm on lanes [hd, hd+intd), computed on full-width vregs.
    lane = jax.lax.broadcasted_iota(jnp.int32, (1, h.shape[-1]), 1)
    cmask = (lane >= hd) & (lane < hd + intd)
    inv = 1.0 / float(intd)
    mu = jnp.sum(jnp.where(cmask, h, 0.0), axis=-1, keepdims=True) * inv
    d = jnp.where(cmask, h - mu, 0.0)
    var = jnp.sum(d * d, axis=-1, keepdims=True) * inv
    ln_c = (h - mu) * jax.lax.rsqrt(var + LN_EPS) * g1_ref[...] + be1_ref[...]
    h = jnp.where(cmask, ln_c, h)

    # concat: ReLU then one bf16 matmul with the zero-row-padded (128, hd) weight.
    z = jnp.maximum(h, 0.0).astype(jnp.bfloat16)
    y = jnp.dot(z, w2_ref[...], preferred_element_type=jnp.float32) + b2_ref[...]

    # final LayerNorm(hd)
    mu2 = jnp.mean(y, axis=-1, keepdims=True)
    d2 = y - mu2
    var2 = jnp.mean(d2 * d2, axis=-1, keepdims=True)
    out = d2 * jax.lax.rsqrt(var2 + LN_EPS) * g2_ref[...] + be2_ref[...]
    out_ref[...] = out.astype(out_ref.dtype)


def fused_forward(slab, params, *, intd, hd, tm):
    """slab: (n_pad, 128) bf16, n_pad multiple of tm. Returns (n_pad, hd) bf16."""
    n_pad, k_pad = slab.shape
    assert n_pad % tm == 0
    grid = (n_pad // tm,)

    weights = (
        params["w1"], params["b1"], params["g1"], params["be1"],
        params["w2"], params["b2"], params["g2"], params["be2"],
    )

    # Row-tiled slab/output; weights pinned to block (0,0) -> VMEM-resident.
    in_specs = [pl.BlockSpec((tm, k_pad), lambda i: (i, 0))]
    in_specs += [pl.BlockSpec(w.shape, lambda i: (0, 0)) for w in weights]
    out_spec = pl.BlockSpec((tm, hd), lambda i: (i, 0))

    weight_bytes = sum(int(w.size) * w.dtype.itemsize for w in weights)
    cost = pl.CostEstimate(
        flops=int(2 * n_pad * k_pad * (k_pad + hd) + 20 * n_pad * k_pad),
        transcendentals=int(2 * n_pad),
        bytes_accessed=int(n_pad * (k_pad * 2 + hd * 2) + weight_bytes),
    )

    kernel = functools.partial(fused_forward_kernel, hd=hd, intd=intd)

    return pl.pallas_call(
        kernel,
        out_shape=jax.ShapeDtypeStruct((n_pad, hd), jnp.bfloat16),
        grid=grid,
        in_specs=in_specs,
        out_specs=out_spec,
        compiler_params=pltpu.CompilerParams(
            dimension_semantics=("parallel",),
            vmem_limit_bytes=32 * 1024 * 1024,  # > v5e's 16-MiB default scope
        ),
        cost_estimate=cost,
    )(slab, *weights)


class ModelBasePallas:
    """JAX/Pallas reimplementation of dkt ModelBase forward."""

    TM_TARGET = 4096  # rows per grid step for large N (128-lane blocks -> tiny VMEM)

    def __init__(self, hidden_dim=64, n_layers=2, n_tests=1538,
                 n_questions=9455, n_tags=913, key=None):
        self.hidden_dim = hidden_dim
        self.n_layers = n_layers
        self.n_tests = n_tests
        self.n_questions = n_questions
        self.n_tags = n_tags
        hd, intd = hidden_dim, hidden_dim // 3
        self.intd = intd
        self.k_raw = 4 * intd + 2                 # embed cols + 2 cont cols
        self.k_pad = _round_up(self.k_raw, 128)   # lane-dense padded width

        if key is None:
            key = jax.random.PRNGKey(0)
        ks = jax.random.split(key, 12)

        def lin_w(k, fan_in, fan_out):
            bound = 1.0 / math.sqrt(fan_in)
            return jax.random.uniform(k, (fan_in, fan_out), jnp.float32,
                                      -bound, bound)

        def lin_b(k, fan_in, fan_out):
            bound = 1.0 / math.sqrt(fan_in)
            return jax.random.uniform(k, (1, fan_out), jnp.float32,
                                      -bound, bound)

        # Embedding tables, N(0, 1) like nn.Embedding.
        self.emb_interaction = jax.random.normal(ks[0], (3, intd), jnp.float32)
        self.emb_test = jax.random.normal(ks[1], (n_tests + 1, intd), jnp.float32)
        self.emb_question = jax.random.normal(ks[2], (n_questions + 1, intd), jnp.float32)
        self.emb_tag = jax.random.normal(ks[3], (n_tags + 1, intd), jnp.float32)

        w_comb = lin_w(ks[4], intd * 4, hd)
        b_comb = lin_b(ks[5], intd * 4, hd)
        w_cont = lin_w(ks[6], 2, intd)
        b_cont = lin_b(ks[7], 2, intd)
        g_cont = jnp.ones((1, intd), jnp.float32)
        be_cont = jnp.zeros((1, intd), jnp.float32)
        w_cat = lin_w(ks[8], intd + hd, hd)       # rows [0:hd)=X, [hd:hd+intd)=cont
        b_cat = lin_b(ks[9], intd + hd, hd)
        g_out = jnp.ones((1, hd), jnp.float32)
        be_out = jnp.zeros((1, hd), jnp.float32)

        # f32 originals for the loose reference check.
        self.f32 = dict(w_comb=w_comb, b_comb=b_comb, w_cont=w_cont,
                        b_cont=b_cont, g_cont=g_cont, be_cont=be_cont,
                        w_cat=w_cat, b_cat=b_cat, g_out=g_out, be_out=be_out)

        # Fold comb_proj and cont_proj into one (128, 128) weight:
        #   cols [0:hd)        <- w_comb (rows 0:4*intd)
        #   cols [hd:hd+intd)  <- w_cont (rows 4*intd : 4*intd+2)
        w1 = jnp.zeros((self.k_pad, self.k_pad), jnp.float32)
        w1 = w1.at[:4 * intd, :hd].set(w_comb)
        w1 = w1.at[4 * intd:4 * intd + 2, hd:hd + intd].set(w_cont)
        b1 = jnp.zeros((1, self.k_pad), jnp.float32)
        b1 = b1.at[:, :hd].set(b_comb).at[:, hd:hd + intd].set(b_cont)
        g1 = jnp.ones((1, self.k_pad), jnp.float32).at[:, hd:hd + intd].set(g_cont)
        be1 = jnp.zeros((1, self.k_pad), jnp.float32).at[:, hd:hd + intd].set(be_cont)
        # Zero-row-padded concat weight: rows match the lane layout of the
        # [relu(X) | relu(LN(cont)) | 0] tile produced in the kernel.
        w2 = jnp.zeros((self.k_pad, hd), jnp.float32).at[:hd + intd, :].set(w_cat)

        self.params = {
            "w1": w1.astype(jnp.bfloat16),
            "b1": b1,
            "g1": g1,
            "be1": be1,
            "w2": w2.astype(jnp.bfloat16),
            "b2": b_cat,
            "g2": g_out,
            "be2": be_out,
        }

        # fc = nn.Linear(hd, 1) exists in __init__ but is unused in forward.
        self.fc_w = lin_w(ks[10], hd, 1)
        self.fc_b = lin_b(ks[11], hd, 1)

    # --- helpers -----------------------------------------------------------
    def _tile_rows(self, n):
        if n <= 2048:
            return _round_up(n, 16)         # single grid step for small inputs
        # big tiles, but keep >=~4 grid steps (2 TensorCores x double-buffer)
        return min(self.TM_TARGET, _round_up(pl.cdiv(n, 4), 512))

    def _build_slab(self, test, question, tag, elapsed, average_user_correct,
                    interaction, dtype=jnp.bfloat16):
        """One fused jnp chain: gathers + concat + cont fold + pad + cast."""
        B, S = interaction.shape
        e_int = jnp.take(self.emb_interaction, interaction.astype(jnp.int32), axis=0)
        e_test = jnp.take(self.emb_test, test.astype(jnp.int32), axis=0)
        e_q = jnp.take(self.emb_question, question.astype(jnp.int32), axis=0)
        e_tag = jnp.take(self.emb_tag, tag.astype(jnp.int32), axis=0)
        cont = jnp.stack([elapsed.astype(jnp.float32),
                          average_user_correct.astype(jnp.float32)], axis=-1)
        pad = jnp.zeros((B, S, self.k_pad - self.k_raw), jnp.float32)
        slab = jnp.concatenate([e_int, e_test, e_q, e_tag, cont, pad], axis=-1)
        return slab.reshape(B * S, self.k_pad).astype(dtype)

    # --- forward -----------------------------------------------------------
    def __call__(self, test, question, tag, elapsed, average_user_correct,
                 correct, mask, interaction):
        batch_size, seq_len = interaction.shape
        n = batch_size * seq_len

        slab = self._build_slab(test, question, tag, elapsed,
                                average_user_correct, interaction)

        tm = self._tile_rows(n)
        n_pad = _round_up(n, tm)
        if n_pad != n:
            slab = jnp.pad(slab, ((0, n_pad - n), (0, 0)))

        out = fused_forward(slab, self.params, intd=self.intd,
                            hd=self.hidden_dim, tm=tm)
        out = out[:n].reshape(batch_size, seq_len, self.hidden_dim)
        return out, batch_size


# --- references --------------------------------------------------------------
def _reference_forward_quantized(model, slab_bf16):
    """Replicates the kernel math (same bf16 quantization) in plain jnp/f32."""
    p = model.params
    hd, intd = model.hidden_dim, model.intd
    h = slab_bf16.astype(jnp.float32) @ p["w1"].astype(jnp.float32) + p["b1"]
    hx = h[:, :hd]
    hc = _layernorm(h[:, hd:hd + intd], p["g1"][:, hd:hd + intd],
                    p["be1"][:, hd:hd + intd])
    n = h.shape[0]
    z = jnp.concatenate(
        [jnp.maximum(hx, 0.0), jnp.maximum(hc, 0.0),
         jnp.zeros((n, model.k_pad - hd - intd), jnp.float32)], axis=-1)
    z = z.astype(jnp.bfloat16).astype(jnp.float32)
    y = z @ p["w2"].astype(jnp.float32) + p["b2"]
    return _layernorm(y, p["g2"], p["be2"])


def _reference_forward_f32(model, test, question, tag, elapsed,
                           average_user_correct, interaction):
    """Full-f32 semantics of the original PyTorch forward."""
    f = model.f32
    e_int = jnp.take(model.emb_interaction, interaction.astype(jnp.int32), axis=0)
    e_test = jnp.take(model.emb_test, test.astype(jnp.int32), axis=0)
    e_q = jnp.take(model.emb_question, question.astype(jnp.int32), axis=0)
    e_tag = jnp.take(model.emb_tag, tag.astype(jnp.int32), axis=0)
    embed = jnp.concatenate([e_int, e_test, e_q, e_tag], axis=-1)
    X = embed @ f["w_comb"] + f["b_comb"]
    cont = jnp.stack([elapsed.astype(jnp.float32),
                      average_user_correct.astype(jnp.float32)], axis=-1)
    c = _layernorm(cont @ f["w_cont"] + f["b_cont"], f["g_cont"], f["be_cont"])
    cat = jnp.concatenate([X, c], axis=-1)
    y = jnp.maximum(cat, 0.0) @ f["w_cat"] + f["b_cat"]
    return _layernorm(y, f["g_out"], f["be_out"])


if __name__ == "__main__":
    B, S = 2, 8
    key = jax.random.PRNGKey(0)
    kmodel, k1, k2, k3, k4, k5, k6 = jax.random.split(key, 7)

    model = ModelBasePallas(hidden_dim=64, key=kmodel)

    test = jax.random.randint(k1, (B, S), 0, model.n_tests + 1)
    question = jax.random.randint(k2, (B, S), 0, model.n_questions + 1)
    tag = jax.random.randint(k3, (B, S), 0, model.n_tags + 1)
    interaction = jax.random.randint(k4, (B, S), 0, 3)
    elapsed = jax.random.uniform(k5, (B, S), jnp.float32, 0.0, 100.0)
    average_user_correct = jax.random.uniform(k6, (B, S), jnp.float32, 0.0, 1.0)
    correct = jnp.zeros((B, S), jnp.int32)   # unused in forward
    mask = jnp.ones((B, S), jnp.int32)       # unused in forward

    run = jax.jit(lambda *a: model(*a)[0])   # jit so gather+concat+pad+cast fuse
    out = run(test, question, tag, elapsed, average_user_correct,
              correct, mask, interaction)
    out = jax.block_until_ready(out)
    bsz = interaction.shape[0]
    assert out.shape == (B, S, model.hidden_dim)
    assert bsz == B
    out_f32 = out.astype(jnp.float32)

    # Tight check: same bf16-quantized slab/weights, f32 math reference.
    slab_q = model._build_slab(test, question, tag, elapsed,
                               average_user_correct, interaction)
    ref_q = _reference_forward_quantized(model, slab_q).reshape(B, S, -1)
    err_q = float(jnp.max(jnp.abs(out_f32 - ref_q)))
    assert err_q < 2e-2, f"tight check failed: max abs err {err_q}"

    # Loose check vs full-f32 semantics (only bf16 quantization differs).
    ref_f = _reference_forward_f32(model, test, question, tag, elapsed,
                                   average_user_correct,
                                   interaction).reshape(B, S, -1)
    err_f = float(jnp.max(jnp.abs(out_f32 - ref_f)))
    assert err_f < 2e-1, f"loose check failed: max abs err {err_f}"

    print("KERNEL_OK")
</pallas_src>

<mosaic_0001>
module attributes {stable_mosaic.version = 11 : i64} {
  func.func @fused_forward_kernel(%arg0: i32, %arg1: memref<16x128xbf16, #tpu.memory_space<vmem>>, %arg2: memref<128x128xbf16, #tpu.memory_space<vmem>>, %arg3: memref<1x128xf32, #tpu.memory_space<vmem>>, %arg4: memref<1x128xf32, #tpu.memory_space<vmem>>, %arg5: memref<1x128xf32, #tpu.memory_space<vmem>>, %arg6: memref<128x64xbf16, #tpu.memory_space<vmem>>, %arg7: memref<1x64xf32, #tpu.memory_space<vmem>>, %arg8: memref<1x64xf32, #tpu.memory_space<vmem>>, %arg9: memref<1x64xf32, #tpu.memory_space<vmem>>, %arg10: memref<16x64xbf16, #tpu.memory_space<vmem>>) attributes {dimension_semantics = [#tpu.dimension_semantics<parallel>], iteration_bounds = array<i64: 1>, scalar_prefetch = 0 : i64, scratch_operands = 0 : i64, tpu.core_type = #tpu.core_type<tc>, window_params = [{transform_indices = @transform_0, window_bounds = array<i64: 16, 128>}, {pipeline_mode = #tpu.pipeline_mode<synchronous>, transform_indices = @transform_1, window_bounds = array<i64: 128, 128>}, {pipeline_mode = #tpu.pipeline_mode<synchronous>, transform_indices = @transform_2, window_bounds = array<i64: 1, 128>}, {pipeline_mode = #tpu.pipeline_mode<synchronous>, transform_indices = @transform_3, window_bounds = array<i64: 1, 128>}, {pipeline_mode = #tpu.pipeline_mode<synchronous>, transform_indices = @transform_4, window_bounds = array<i64: 1, 128>}, {pipeline_mode = #tpu.pipeline_mode<synchronous>, transform_indices = @transform_5, window_bounds = array<i64: 128, 64>}, {pipeline_mode = #tpu.pipeline_mode<synchronous>, transform_indices = @transform_6, window_bounds = array<i64: 1, 64>}, {pipeline_mode = #tpu.pipeline_mode<synchronous>, transform_indices = @transform_7, window_bounds = array<i64: 1, 64>}, {pipeline_mode = #tpu.pipeline_mode<synchronous>, transform_indices = @transform_8, window_bounds = array<i64: 1, 64>}, {transform_indices = @transform_9, window_bounds = array<i64: 16, 64>}]} {
    %c0 = arith.constant 0 : index
    %c0_0 = arith.constant 0 : index
    %0 = vector.load %arg1[%c0, %c0_0] : memref<16x128xbf16, #tpu.memory_space<vmem>>, vector<16x128xbf16>
    %c0_1 = arith.constant 0 : index
    %c0_2 = arith.constant 0 : index
    %1 = vector.load %arg2[%c0_1, %c0_2] : memref<128x128xbf16, #tpu.memory_space<vmem>>, vector<128x128xbf16>
    %cst = arith.constant dense<0.000000e+00> : vector<16x128xf32>
    %2 = tpu.matmul %0, %1, %cst {dimension_numbers = #tpu.dot_dimension_numbers<[1], [0], [0], [1], [0, 0, 1, 1], [], []>} : vector<16x128xbf16>, vector<128x128xbf16>, vector<16x128xf32> -> vector<16x128xf32>
    %c0_3 = arith.constant 0 : index
    %c0_4 = arith.constant 0 : index
    %3 = vector.load %arg3[%c0_3, %c0_4] : memref<1x128xf32, #tpu.memory_space<vmem>>, vector<1x128xf32>
    %4 = vector.broadcast %3 : vector<1x128xf32> to vector<16x128xf32>
    %5 = arith.addf %2, %4 : vector<16x128xf32>
    %6 = tpu.iota {dimensions = array<i32: 1>} : vector<1x128xi32>
    %c64_i32 = arith.constant 64 : i32
    %7 = vector.broadcast %c64_i32 : i32 to vector<1x128xi32>
    %8 = arith.cmpi sge, %6, %7 : vector<1x128xi32>
    %c85_i32 = arith.constant 85 : i32
    %9 = vector.broadcast %c85_i32 : i32 to vector<1x128xi32>
    %10 = arith.cmpi slt, %6, %9 : vector<1x128xi32>
    %11 = arith.andi %8, %10 : vector<1x128xi1>
    %cst_5 = arith.constant 0.000000e+00 : f32
    %12 = vector.shape_cast %11 : vector<1x128xi1> to vector<1x128xi1>
    %13 = vector.broadcast %12 : vector<1x128xi1> to vector<16x128xi1>
    %14 = vector.broadcast %cst_5 : f32 to vector<16x128xf32>
    %15 = arith.select %13, %5, %14 : vector<16x128xi1>, vector<16x128xf32>
    %cst_6 = arith.constant dense<0.000000e+00> : vector<16xf32>
    %16 = vector.multi_reduction <add>, %15, %cst_6 [1] : vector<16x128xf32> to vector<16xf32>
    %17 = vector.shape_cast %16 : vector<16xf32> to vector<16x1xf32>
    %cst_7 = arith.constant 0.0476190485 : f32
    %18 = vector.broadcast %cst_7 : f32 to vector<16x1xf32>
    %19 = arith.mulf %17, %18 : vector<16x1xf32>
    %20 = vector.broadcast %19 : vector<16x1xf32> to vector<16x128xf32>
    %21 = arith.subf %5, %20 : vector<16x128xf32>
    %cst_8 = arith.constant 0.000000e+00 : f32
    %22 = vector.shape_cast %11 : vector<1x128xi1> to vector<1x128xi1>
    %23 = vector.broadcast %22 : vector<1x128xi1> to vector<16x128xi1>
    %24 = vector.broadcast %cst_8 : f32 to vector<16x128xf32>
    %25 = arith.select %23, %21, %24 : vector<16x128xi1>, vector<16x128xf32>
    %26 = arith.mulf %25, %25 : vector<16x128xf32>
    %cst_9 = arith.constant dense<0.000000e+00> : vector<16xf32>
    %27 = vector.multi_reduction <add>, %26, %cst_9 [1] : vector<16x128xf32> to vector<16xf32>
    %28 = vector.shape_cast %27 : vector<16xf32> to vector<16x1xf32>
    %cst_10 = arith.constant 0.0476190485 : f32
    %29 = vector.broadcast %cst_10 : f32 to vector<16x1xf32>
    %30 = arith.mulf %28, %29 : vector<16x1xf32>
    %31 = vector.broadcast %19 : vector<16x1xf32> to vector<16x128xf32>
    %32 = arith.subf %5, %31 : vector<16x128xf32>
    %cst_11 = arith.constant 9.99999974E-6 : f32
    %33 = vector.broadcast %cst_11 : f32 to vector<16x1xf32>
    %34 = arith.addf %30, %33 : vector<16x1xf32>
    %35 = math.rsqrt %34 : vector<16x1xf32>
    %36 = vector.broadcast %35 : vector<16x1xf32> to vector<16x128xf32>
    %37 = arith.mulf %32, %36 : vector<16x128xf32>
    %c0_12 = arith.constant 0 : index
    %c0_13 = arith.constant 0 : index
    %38 = vector.load %arg4[%c0_12, %c0_13] : memref<1x128xf32, #tpu.memory_space<vmem>>, vector<1x128xf32>
    %39 = vector.broadcast %38 : vector<1x128xf32> to vector<16x128xf32>
    %40 = arith.mulf %37, %39 : vector<16x128xf32>
    %c0_14 = arith.constant 0 : index
    %c0_15 = arith.constant 0 : index
    %41 = vector.load %arg5[%c0_14, %c0_15] : memref<1x128xf32, #tpu.memory_space<vmem>>, vector<1x128xf32>
    %42 = vector.broadcast %41 : vector<1x128xf32> to vector<16x128xf32>
    %43 = arith.addf %40, %42 : vector<16x128xf32>
    %44 = vector.shape_cast %11 : vector<1x128xi1> to vector<1x128xi1>
    %45 = vector.broadcast %44 : vector<1x128xi1> to vector<16x128xi1>
    %46 = arith.select %45, %43, %5 : vector<16x128xi1>, vector<16x128xf32>
    %cst_16 = arith.constant 0.000000e+00 : f32
    %47 = vector.broadcast %cst_16 : f32 to vector<16x128xf32>
    %48 = arith.maximumf %46, %47 : vector<16x128xf32>
    %49 = arith.truncf %48 : vector<16x128xf32> to vector<16x128xbf16>
    %c0_17 = arith.constant 0 : index
    %c0_18 = arith.constant 0 : index
    %50 = vector.load %arg6[%c0_17, %c0_18] : memref<128x64xbf16, #tpu.memory_space<vmem>>, vector<128x64xbf16>
    %cst_19 = arith.constant dense<0.000000e+00> : vector<16x64xf32>
    %51 = tpu.matmul %49, %50, %cst_19 {dimension_numbers = #tpu.dot_dimension_numbers<[1], [0], [0], [1], [0, 0, 1, 1], [], []>} : vector<16x128xbf16>, vector<128x64xbf16>, vector<16x64xf32> -> vector<16x64xf32>
    %c0_20 = arith.constant 0 : index
    %c0_21 = arith.constant 0 : index
    %52 = vector.load %arg7[%c0_20, %c0_21] : memref<1x64xf32, #tpu.memory_space<vmem>>, vector<1x64xf32>
    %53 = vector.broadcast %52 : vector<1x64xf32> to vector<16x64xf32>
    %54 = arith.addf %51, %53 : vector<16x64xf32>
    %cst_22 = arith.constant dense<0.000000e+00> : vector<16xf32>
    %55 = vector.multi_reduction <add>, %54, %cst_22 [1] : vector<16x64xf32> to vector<16xf32>
    %56 = vector.shape_cast %55 : vector<16xf32> to vector<16x1xf32>
    %cst_23 = arith.constant 6.400000e+01 : f32
    %57 = vector.broadcast %cst_23 : f32 to vector<16x1xf32>
    %58 = arith.divf %56, %57 : vector<16x1xf32>
    %59 = vector.broadcast %58 : vector<16x1xf32> to vector<16x64xf32>
    %60 = arith.subf %54, %59 : vector<16x64xf32>
    %61 = arith.mulf %60, %60 : vector<16x64xf32>
    %cst_24 = arith.constant dense<0.000000e+00> : vector<16xf32>
    %62 = vector.multi_reduction <add>, %61, %cst_24 [1] : vector<16x64xf32> to vector<16xf32>
    %63 = vector.shape_cast %62 : vector<16xf32> to vector<16x1xf32>
    %cst_25 = arith.constant 6.400000e+01 : f32
    %64 = vector.broadcast %cst_25 : f32 to vector<16x1xf32>
    %65 = arith.divf %63, %64 : vector<16x1xf32>
    %cst_26 = arith.constant 9.99999974E-6 : f32
    %66 = vector.broadcast %cst_26 : f32 to vector<16x1xf32>
    %67 = arith.addf %65, %66 : vector<16x1xf32>
    %68 = math.rsqrt %67 : vector<16x1xf32>
    %69 = vector.broadcast %68 : vector<16x1xf32> to vector<16x64xf32>
    %70 = arith.mulf %60, %69 : vector<16x64xf32>
    %c0_27 = arith.constant 0 : index
    %c0_28 = arith.constant 0 : index
    %71 = vector.load %arg8[%c0_27, %c0_28] : memref<1x64xf32, #tpu.memory_space<vmem>>, vector<1x64xf32>
    %72 = vector.broadcast %71 : vector<1x64xf32> to vector<16x64xf32>
    %73 = arith.mulf %70, %72 : vector<16x64xf32>
    %c0_29 = arith.constant 0 : index
    %c0_30 = arith.constant 0 : index
    %74 = vector.load %arg9[%c0_29, %c0_30] : memref<1x64xf32, #tpu.memory_space<vmem>>, vector<1x64xf32>
    %75 = vector.broadcast %74 : vector<1x64xf32> to vector<16x64xf32>
    %76 = arith.addf %73, %75 : vector<16x64xf32>
    %77 = arith.truncf %76 : vector<16x64xf32> to vector<16x64xbf16>
    %c0_31 = arith.constant 0 : index
    %c0_32 = arith.constant 0 : index
    %78 = vector.load %arg10[%c0_31, %c0_32] : memref<16x64xbf16, #tpu.memory_space<vmem>>, vector<16x64xbf16>
    tpu.vector_store %arg10[%c0_31, %c0_32], %77 {strides = array<i32>} : memref<16x64xbf16, #tpu.memory_space<vmem>>, vector<16x64xbf16>,
    return
  }
  func.func @transform_0(%arg0: i32) -> (i32, i32) {
    %c0_i32 = arith.constant 0 : i32
    %c0_i32_0 = arith.constant 0 : i32
    return %arg0, %c0_i32 : i32, i32
  }
  func.func @transform_1(%arg0: i32) -> (i32, i32) {
    %c0_i32 = arith.constant 0 : i32
    %c0_i32_0 = arith.constant 0 : i32
    %c0_i32_1 = arith.constant 0 : i32
    return %c0_i32, %c0_i32_0 : i32, i32
  }
  func.func @transform_2(%arg0: i32) -> (i32, i32) {
    %c0_i32 = arith.constant 0 : i32
    %c0_i32_0 = arith.constant 0 : i32
    %c0_i32_1 = arith.constant 0 : i32
    return %c0_i32, %c0_i32_0 : i32, i32
  }
  func.func @transform_3(%arg0: i32) -> (i32, i32) {
    %c0_i32 = arith.constant 0 : i32
    %c0_i32_0 = arith.constant 0 : i32
    %c0_i32_1 = arith.constant 0 : i32
    return %c0_i32, %c0_i32_0 : i32, i32
  }
  func.func @transform_4(%arg0: i32) -> (i32, i32) {
    %c0_i32 = arith.constant 0 : i32
    %c0_i32_0 = arith.constant 0 : i32
    %c0_i32_1 = arith.constant 0 : i32
    return %c0_i32, %c0_i32_0 : i32, i32
  }
  func.func @transform_5(%arg0: i32) -> (i32, i32) {
    %c0_i32 = arith.constant 0 : i32
    %c0_i32_0 = arith.constant 0 : i32
    %c0_i32_1 = arith.constant 0 : i32
    return %c0_i32, %c0_i32_0 : i32, i32
  }
  func.func @transform_6(%arg0: i32) -> (i32, i32) {
    %c0_i32 = arith.constant 0 : i32
    %c0_i32_0 = arith.constant 0 : i32
    %c0_i32_1 = arith.constant 0 : i32
    return %c0_i32, %c0_i32_0 : i32, i32
  }
  func.func @transform_7(%arg0: i32) -> (i32, i32) {
    %c0_i32 = arith.constant 0 : i32
    %c0_i32_0 = arith.constant 0 : i32
    %c0_i32_1 = arith.constant 0 : i32
    return %c0_i32, %c0_i32_0 : i32, i32
  }
  func.func @transform_8(%arg0: i32) -> (i32, i32) {
    %c0_i32 = arith.constant 0 : i32
    %c0_i32_0 = arith.constant 0 : i32
    %c0_i32_1 = arith.constant 0 : i32
    return %c0_i32, %c0_i32_0 : i32, i32
  }
  func.func @transform_9(%arg0: i32) -> (i32, i32) {
    %c0_i32 = arith.constant 0 : i32
    %c0_i32_0 = arith.constant 0 : i32
    return %arg0, %c0_i32 : i32, i32
  }
}

</mosaic_0001>

<bundles_post_ra>
// kernel: _lambda_.1
= control target key start
LH: loop header
LB: loop body
LE: loop exit
PB: predicated region body
PF: predicated region fallthrough
CT: control target
= control target key end

     0   :  { %14 = vsyncpa [#allocation3], 0  ;;  %s817_s0 = inlined_call_operand.vmem [shape: bf16[16,128], index: 0, kind: input, shape index: {}]   ;;  %s818_s1 = inlined_call_operand.hbm [shape: bf16[128,128], index: 1, kind: input, shape index: {}]   ;;  %s819_s2 = inlined_call_operand.hbm [shape: f32[1,128], index: 2, kind: input, shape index: {}]   ;;  %s820_s3 = inlined_call_operand.vmem [shape: f32[1,128], index: 3, kind: input, shape index: {}]   ;;  %s821_s4 = inlined_call_operand.vmem [shape: f32[1,128], index: 4, kind: input, shape index: {}]   ;;  %s822_s5 = inlined_call_operand.hbm [shape: bf16[128,64], index: 5, kind: input, shape index: {}]   ;;  %s823_s6 = inlined_call_operand.hbm [shape: f32[1,64], index: 6, kind: input, shape index: {}]   ;;  %s824_s7 = inlined_call_operand.vmem [shape: f32[1,64], index: 7, kind: input, shape index: {}]   ;;  %s825_s8 = inlined_call_operand.vmem [shape: f32[1,64], index: 8, kind: input, shape index: {}]   ;;  %s826_s9 = inlined_call_operand.hbm [shape: bf16[16,64], index: 9, kind: output, shape index: {}]  }
   0x1   :  { %15 = vsyncpa [#allocation6], 0 }
   0x2   :  { %16 = vsyncpa [#allocation9], 0 }
   0x3   :  { %17 = vsyncpa [#allocation4], 0  ;;  %s676_s30 = smov [#allocation5]   ;;  %s677_s11 = smov [#allocation2]  }
   0x4   :  { %s38_s10 = sshll.u32 %s676_s30, 4  ;;  %s25_s12 = sshll.u32 %s677_s11, 4  ;;  %s39_s10 = int_to_ptr.vmem [resolvable:$true] %s38_s10  ;;  %s26_s12 = int_to_ptr.vmem [resolvable:$true] %s25_s12 }
   0x5   :  { %s576_s13 = scalar_lea.vmem %s39_s10, 16  ;;  %s580_s14 = scalar_lea.vmem %s39_s10, 32 }
   0x6   :  { %p577_p0 = scmp.ne.s32.totalorder %s39_s10, %s576_s13  ;;  %p581_p1 = scmp.lt.s32.totalorder %s39_s10, %s39_s10 }
   0x7   :  { %p582_p2 = scmp.lt.s32.totalorder %s580_s14, %s576_s13 }
   0x9   :  { %p583_p3 = por %p582_p2, %p581_p1 }
   0xb   :  { %p584_p4 = pnand %p583_p3, %p577_p0 }
   0xd   :  { %587 = shalt.err (!%p584_p4)
}
   0xe   :  { %41 = dma.hbm_to_vmem [thread:$0]  %s819_s2, 16, %s39_s10, [#allocation6]  }
   0xf   :  { %s596_s17 = scalar_lea.vmem %s26_s12, 1024  ;;  %p601_p6 = scmp.lt.s32.totalorder %s26_s12, %s26_s12 }
  0x10   :  { %p597_p5 = scmp.ne.s32.totalorder %s26_s12, %s596_s17  ;;  %p602_p7 = scmp.lt.s32.totalorder %s596_s17, %s596_s17 }
  0x12   :  { %p603_p8 = por %p602_p7, %p601_p6 }
  0x14   :  { %p604_p9 = pnand %p603_p8, %p597_p5 }
  0x16   :  { %607 = shalt.err (!%p604_p9)
}
  0x17   :  { %s678_s18 = smov 64   ;;  %s679_s19 = smov 4  }
  0x18   :  { %31 = dma.hbm_to_vmem [thread:$0]  %s818_s1, 1024, %s26_s12, [#allocation3], %s678_s18, %s678_s18, %s679_s19  }
  0x19   :  { %s680_s22 = smov [#allocation7]   ;;  %s681_s24 = smov [#allocation8]  }
  0x1a   :  { %s51_s23 = sshll.u32 %s680_s22, 4  ;;  %s64_s2 = sshll.u32 %s681_s24, 4  ;;  %s52_s23 = int_to_ptr.vmem [resolvable:$true] %s51_s23  ;;  %s65_s2 = int_to_ptr.vmem [resolvable:$true] %s64_s2 }
  0x1b   :  { %s616_s25 = scalar_lea.vmem %s52_s23, 1024  ;;  %p621_p11 = scmp.lt.s32.totalorder %s52_s23, %s52_s23 }
  0x1c   :  { %p617_p10 = scmp.ne.s32.totalorder %s52_s23, %s616_s25  ;;  %p622_p12 = scmp.lt.s32.totalorder %s616_s25, %s616_s25 }
  0x1e   :  { %p623_p13 = por %p622_p12, %p621_p11 }
  0x20   :  { %p624_p0 = pnand %p623_p13, %p617_p10 }
  0x22   :  { %627 = shalt.err (!%p624_p0)
}
  0x23   :  { %57 = dma.hbm_to_vmem [thread:$0]  %s822_s5, 1024, %s52_s23, [#allocation6], %s678_s18, %s678_s18, %s679_s19  }
  0x24   :  { %s636_s1 = scalar_lea.vmem %s65_s2, 16  ;;  %s640_s28 = scalar_lea.vmem %s65_s2, 32 }
  0x25   :  { %p637_p1 = scmp.ne.s32.totalorder %s65_s2, %s636_s1  ;;  %p641_p2 = scmp.lt.s32.totalorder %s65_s2, %s65_s2 }
  0x26   :  { %p642_p3 = scmp.lt.s32.totalorder %s640_s28, %s636_s1 }
  0x28   :  { %p643_p4 = por %p642_p3, %p641_p2 }
  0x2a   :  { %p644_p5 = pnand %p643_p4, %p637_p1 }
  0x2c   :  { %647 = shalt.err (!%p644_p5)
}
  0x2d   :  { %67 = dma.hbm_to_vmem [thread:$0]  %s823_s6, 16, %s65_s2, [#allocation9]  }
  0x2e   :  { %668 = dma.done.wait [#allocation3], 1024  }
  0x2f   :  { %669 = vsyncadd [#allocation3], 4294966272 }
  0x30   :  { %670 = dma.done.wait [#allocation6], 1040  }
  0x31   :  { %671 = vsyncadd [#allocation6], 4294966256 }
  0x32   :  { %672 = dma.done.wait [#allocation9], 16  }
  0x33   :  { %673 = vsyncadd [#allocation9], 4294967280  ;;  %v682_v0 = vmov 0.0   ;;  %vm683_vm0 = vmmov 0   ;;  %v543_v1 = vld [vmem:[#allocation2 + $0x38] sm:$0xff]   ;;  %v544_v2 = vld [vmem:[#allocation2 + $0x30] sm:$0xff]   ;;  %v205_v10 = vlaneseq }
  0x34   :  { %494 = vmatprep.subr.bf16.mxu0 %v682_v0  ;;  %510 = vmatprep.mubr.msk.bf16.mxu0 %vm683_vm0, %v682_v0  ;;  %v545_v3 = vld [vmem:[#allocation2 + $0x28] sm:$0xff]   ;;  %v546_v4 = vld [vmem:[#allocation2 + $0x20] sm:$0xff]   ;;  %v547_v5 = vld [vmem:[#allocation2 + $0x18] sm:$0xff]   ;;  %vm373_vm4 = vcmask 523264   ;;  %vm427_vm5 = vcmask 519168   ;;  %s684_s15 = smov [#allocation10]  }
  0x35   :  { %514 = vmatprep.subr.bf16.mxu1 %v682_v0  ;;  %530 = vmatprep.mubr.msk.bf16.mxu1 %vm683_vm0, %v682_v0  ;;  %v548_v6 = vld [vmem:[#allocation2 + $0x10] sm:$0xff]   ;;  %v549_v7 = vld [vmem:[#allocation2 + $0x8] sm:$0xff]   ;;  %v550_v8 = vld [vmem:[#allocation2] sm:$0xff]   ;;  %v206_v11 = vand.u32 127, %v205_v10  ;;  %s435_s16 = sshll.u32 %s684_s15, 4  ;;  %s436_s16 = int_to_ptr.vmem [resolvable:$true] %s435_s16 }
  0x36   :  { %495 = vmatpush3.bf16.msra.mxu0 %v543_v1  ;;  %v551_v9 = vld [vmem:[%s817_s0] sm:$0xff]   ;;  %v553_v33 = vld [vmem:[#allocation7 + $0x30] sm:$0xff]   ;;  %v554_v34 = vld [vmem:[#allocation7 + $0x28] sm:$0xff]   ;;  %p653_p7 = scmp.lt.s32.totalorder %s436_s16, %s436_s16 }
  0x37   :  { %496 = vmatprep.subr.bf16.mxu0 %v682_v0  ;;  %vm207_vm1 = vcmp.ge.s32.totalorder %v206_v11, 64  ;;  %vm208_vm2 = vcmp.lt.s32.totalorder %v206_v11, 85  ;;  %v449_v12 = vld [vmem:[#allocation5] ss:$0 sm:$0xff]  ;;  %v555_v35 = vld [vmem:[#allocation7 + $0x20] sm:$0xff]   ;;  %v557_v37 = vld [vmem:[#allocation7 + $0x10] sm:$0xff]  }
  0x38   :  { %vm767_vm3 = vmand %vm207_vm1, %vm208_vm2  ;;  %v552_v32 = vld [vmem:[#allocation7 + $0x38] sm:$0xff]   ;;  %v558_v38 = vld [vmem:[#allocation7 + $0x8] sm:$0xff]  }
  0x39   :  { %515 = vmatpush3.bf16.msra.mxu1 %v552_v32  ;;  %v556_v36 = vld [vmem:[#allocation7 + $0x18] sm:$0xff]   ;;  %v559_v39 = vld [vmem:[#allocation7] sm:$0xff]  }
  0x3a   :  { %497 = vmatpush3.bf16.msra.mxu0 %v544_v2  ;;  %516 = vmatprep.subr.bf16.mxu1 %v682_v0  ;;  %v459_v47 = vld [vmem:[%s820_s3] ss:$0 sm:$0xff]  ;;  %v461_v61 = vld [vmem:[#allocation8] ss:$0 sm:$0xff] }
  0x3b   :  { %498 = vmatprep.subr.bf16.mxu0 %v682_v0  ;;  %v460_v49 = vld [vmem:[%s821_s4] ss:$0 sm:$0xff] }
  0x3d   :  { %517 = vmatpush3.bf16.msra.mxu1 %v553_v33 }
  0x3e   :  { %499 = vmatpush3.bf16.msra.mxu0 %v545_v3  ;;  %518 = vmatprep.subr.bf16.mxu1 %v682_v0 }
  0x3f   :  { %500 = vmatprep.subr.bf16.mxu0 %v682_v0 }
  0x41   :  { %519 = vmatpush3.bf16.msra.mxu1 %v554_v34 }
  0x42   :  { %501 = vmatpush3.bf16.msra.mxu0 %v546_v4  ;;  %520 = vmatprep.subr.bf16.mxu1 %v682_v0 }
  0x43   :  { %502 = vmatprep.subr.bf16.mxu0 %v682_v0 }
  0x45   :  { %521 = vmatpush3.bf16.msra.mxu1 %v555_v35 }
  0x46   :  { %503 = vmatpush3.bf16.msra.mxu0 %v547_v5  ;;  %522 = vmatprep.subr.bf16.mxu1 %v682_v0 }
  0x47   :  { %504 = vmatprep.subr.bf16.mxu0 %v682_v0 }
  0x49   :  { %523 = vmatpush3.bf16.msra.mxu1 %v556_v36 }
  0x4a   :  { %505 = vmatpush3.bf16.msra.mxu0 %v548_v6  ;;  %524 = vmatprep.subr.bf16.mxu1 %v682_v0 }
  0x4b   :  { %506 = vmatprep.subr.bf16.mxu0 %v682_v0 }
  0x4d   :  { %525 = vmatpush3.bf16.msra.mxu1 %v557_v37 }
  0x4e   :  { %507 = vmatpush3.bf16.msra.mxu0 %v549_v7  ;;  %526 = vmatprep.subr.bf16.mxu1 %v682_v0 }
  0x4f   :  { %508 = vmatprep.subr.bf16.mxu0 %v682_v0 }
  0x51   :  { %527 = vmatpush3.bf16.msra.mxu1 %v558_v38 }
  0x52   :  { %509 = vmatpush3.bf16.msra.mxu0 %v550_v8  ;;  %528 = vmatprep.subr.bf16.mxu1 %v682_v0 }
  0x55   :  { %511 = vmatmul.mubr.bf16.vlgmr.msra.gmra.mxu0 %v551_v9  ;;  %529 = vmatpush3.bf16.msra.mxu1 %v559_v39 }
 0x115   :  { %v198_v13 = vpop.f32.mrf.mxu0 }
 0x116   :  { %v771_v15 = vadd.f32 %v449_v12, %v198_v13 }
 0x117   :  { %v512_v16 = vpop.f32.mrf.mxu0 }
 0x118   :  { %v212_v17 = vsel %vm767_vm3, %v771_v15, 0.0 }
 0x119   :  { %214 = vadd.xlane.f32.xlu0 %v212_v17  ;;  %v201_v18 = vpop.f32.mrf.mxu0 }
 0x11a   :  { %v202_v19 = vadd.f32 %v449_v12, %v201_v18 }
 0x11b   :  { %v513_v20 = vpop.f32.mrf.mxu0 }
 0x11c   :  { %v213_v21 = vsel %vm767_vm3, %v202_v19, 0.0 }
 0x11d   :  { %216 = vadd.xlane.f32.xlu0 %v213_v21 }
 0x1a2   :  { %v215_v22 = vpop.xlane.xlu0 %214 }
 0x1a3   :  { %v218_v23 = vmul.f32 0.04761905, %v215_v22 }
 0x1a5   :  { %v220_v24 = vsub.f32 %v771_v15, %v218_v23  ;;  %v470_v23 = vld [vmem:[%s824_s7] ss:$0 sm:$0xff]  ;;  %s648_s7 = scalar_lea.vmem %s436_s16, 128 }
 0x1a6   :  { %v217_v25 = vpop.xlane.xlu0 %216  ;;  %p649_p6 = scmp.ne.s32.totalorder %s436_s16, %s648_s7  ;;  %p654_p8 = scmp.lt.s32.totalorder %s648_s7, %s648_s7 }
 0x1a7   :  { %v219_v26 = vmul.f32 0.04761905, %v217_v25  ;;  %v222_v27 = vsel %vm767_vm3, %v220_v24, 0.0  ;;  %v471_v25 = vld [vmem:[%s825_s8] ss:$0 sm:$0xff] }
 0x1a8   :  { %v224_v28 = vmul.f32 %v222_v27, %v222_v27  ;;  %p655_p9 = por %p654_p8, %p653_p7 }
 0x1a9   :  { %v221_v29 = vsub.f32 %v202_v19, %v219_v26 }
 0x1aa   :  { %226 = vadd.xlane.f32.xlu1 %v224_v28  ;;  %p656_p10 = pnand %p655_p9, %p649_p6 }
 0x1ab   :  { %v223_v30 = vsel %vm767_vm3, %v221_v29, 0.0 }
 0x1ac   :  { %v225_v31 = vmul.f32 %v223_v30, %v223_v30 }
 0x1ae   :  { %228 = vadd.xlane.f32.xlu1 %v225_v31 }
 0x233   :  { %v227_v40 = vpop.xlane.xlu1 %226 }
 0x234   :  { %v230_v41 = vmul.f32 0.04761905, %v227_v40 }
 0x236   :  { %v232_v42 = vadd.f32 1e-05, %v230_v41 }
 0x237   :  { %v229_v43 = vpop.xlane.xlu1 %228 }
 0x238   :  { %560 = vrsqrt.f32 %v232_v42  ;;  %v231_v44 = vmul.f32 0.04761905, %v229_v43 }
 0x23a   :  { %v233_v45 = vadd.f32 1e-05, %v231_v44 }
 0x23c   :  { %562 = vrsqrt.f32 %v233_v45 }
 0x245   :  { %v561_v46 = vpop.eup %560 }
 0x246   :  { %v236_v48 = vmul.f32 %v561_v46, %v220_v24 }
 0x248   :  { %v245_v50 = vmul.f32 %v459_v47, %v236_v48 }
 0x249   :  { %v563_v51 = vpop.eup %562 }
 0x24a   :  { %v237_v52 = vmul.f32 %v563_v51, %v221_v29  ;;  %v254_v53 = vadd.f32 %v460_v49, %v245_v50 }
 0x24c   :  { %v246_v54 = vmul.f32 %v459_v47, %v237_v52  ;;  %v256_v56 = vsel %vm767_vm3, %v254_v53, %v771_v15 }
 0x24d   :  { %v258_v58 = vmax.f32 %v256_v56, 0.0 }
 0x24e   :  { %v255_v55 = vadd.f32 %v460_v49, %v246_v54 }
 0x250   :  { %v257_v57 = vsel %vm767_vm3, %v255_v55, %v202_v19 }
 0x251   :  { %v259_v59 = vmax.f32 %v257_v57, 0.0 }
 0x253   :  { %v260_v60 = vpack.c.bf16 %v259_v59, %v258_v58 }
 0x255   :  { %531 = vmatmul.mubr.bf16.vlgmr.msra.gmra.mxu1 %v260_v60 }
 0x315   :  { %v366_v62 = vpop.f32.mrf.mxu1 }
 0x316   :  { %v367_v63 = vadd.f32 %v461_v61, %v366_v62 }
 0x317   :  { %v532_v0 = vpop.f32.mrf.mxu1 }
 0x318   :  { %v374_v1 = vsel %vm373_vm4, %v367_v63, 0.0 }
 0x319   :  { %375 = vadd.xlane.f32.xlu0 %v374_v1  ;;  %v369_v2 = vpop.f32.mrf.mxu1 }
 0x31a   :  { %v370_v3 = vadd.f32 %v461_v61, %v369_v2 }
 0x31b   :  { %v533_v4 = vpop.f32.mrf.mxu1 }
 0x31c   :  { %v377_v5 = vsel %vm373_vm4, %v370_v3, 0.0 }
 0x31d   :  { %378 = vadd.xlane.f32.xlu1 %v377_v5 }
 0x3a2   :  { %v376_v6 = vpop.xlane.xlu0 %375 }
 0x3a3   :  { %v381_v7 = vmul.f32 0.015625, %v376_v6 }
 0x3a5   :  { %v383_v8 = vsub.f32 %v367_v63, %v381_v7 }
 0x3a6   :  { %v379_v9 = vpop.xlane.xlu1 %378 }
 0x3a7   :  { %v382_v10 = vmul.f32 0.015625, %v379_v9  ;;  %v385_v11 = vmul.f32 %v383_v8, %v383_v8 }
 0x3a9   :  { %v384_v12 = vsub.f32 %v370_v3, %v382_v10  ;;  %v387_v13 = vsel %vm373_vm4, %v385_v11, 0.0 }
 0x3aa   :  { %388 = vadd.xlane.f32.xlu0 %v387_v13 }
 0x3ab   :  { %v386_v14 = vmul.f32 %v384_v12, %v384_v12 }
 0x3ad   :  { %v390_v15 = vsel %vm373_vm4, %v386_v14, 0.0 }
 0x3ae   :  { %391 = vadd.xlane.f32.xlu1 %v390_v15 }
 0x433   :  { %v389_v16 = vpop.xlane.xlu0 %388 }
 0x434   :  { %v393_v17 = vmul.f32 0.015625, %v389_v16 }
 0x436   :  { %v395_v18 = vadd.f32 1e-05, %v393_v17 }
 0x437   :  { %v392_v19 = vpop.xlane.xlu1 %391 }
 0x438   :  { %564 = vrsqrt.f32 %v395_v18  ;;  %v394_v20 = vmul.f32 0.015625, %v392_v19 }
 0x43a   :  { %v396_v21 = vadd.f32 1e-05, %v394_v20 }
 0x43c   :  { %566 = vrsqrt.f32 %v396_v21 }
 0x445   :  { %v565_v22 = vpop.eup %564 }
 0x446   :  { %v399_v24 = vmul.f32 %v565_v22, %v383_v8 }
 0x448   :  { %v408_v26 = vmul.f32 %v470_v23, %v399_v24 }
 0x449   :  { %v567_v27 = vpop.eup %566 }
 0x44a   :  { %v400_v28 = vmul.f32 %v567_v27, %v384_v12  ;;  %v417_v29 = vadd.f32 %v471_v25, %v408_v26 }
 0x44c   :  { %v409_v30 = vmul.f32 %v470_v23, %v400_v28  ;;  %v474_v31 = vpack.c.bf16 %v417_v29, %v417_v29 }
 0x44e   :  { %v418_v32 = vadd.f32 %v471_v25, %v409_v30  ;;  %428 = vst.msk [vmem:[#allocation10] sm:$0xf] %vm427_vm5, %v474_v31 }
 0x450   :  { %v475_v33 = vpack.c.bf16 %v418_v32, %v418_v32 }
 0x452   :  { %429 = vst.msk [vmem:[#allocation10 + $0x4] sm:$0xf] %vm427_vm5, %v475_v33 }
 0x453   :  { %659 = shalt.err (!%p656_p10)
}
 0x454   :  { %441 = dma.vmem_to_hbm [thread:$0]  %s436_s16, 128, %s826_s9, [#allocation4], %s678_s18, %s678_s18, %s679_s19  }
 0x455   :  { %674 = dma.done.wait [#allocation4], 128  }
 0x456   :  { %675 = vsyncadd [#allocation4], 4294967168 }
 0x457   :  { %445 = vsyncpa [#allocation3], 1 }
 0x458   :  { %446 = vsyncpa [#allocation6], 1 }
 0x459   :  { %447 = vsyncpa [#allocation9], 1 }
 0x45a   :  { %448 = vsyncpa [#allocation4], 1 }

</bundles_post_ra>
